<compile_context>
chip_gen: v7x
topology: tpu7x:2x2x1
jax: 0.10.0
libtpu: 0.0.40
codegen_flags: <defaults>
</compile_context>

<pallas_src>
import functools
import math

import jax
import jax.numpy as jnp
from jax import lax
from jax.experimental import pallas as pl
from jax.experimental.pallas import tpu as pltpu

TILE_B = 4096   # max batch columns per grid step (multiple of _SUB)
_SUB = 512      # inner sub-block width (lanes) per fori_loop iteration


def _round_up(n, m):
    return ((n + m - 1) // m) * m


def _choose_tiling(batch, max_tile_b):
    """Pick (padded_batch, tile_b, sub) with tile_b % sub == 0, 128 | sub."""
    max_tile_b = max(128, _round_up(max_tile_b, 128))
    tile_b = min(max_tile_b, _round_up(batch, 128))
    if tile_b > _SUB:
        tile_b = _round_up(tile_b, _SUB)
    padded = _round_up(batch, tile_b)
    sub = _SUB if tile_b % _SUB == 0 else tile_b
    return padded, tile_b, sub


def mlp_kernel(xT_ref, w1_ref, b1_ref, w2_ref, b2_ref, w3_ref, b3_ref, o_ref,
               *, sub, n_sub):
    """One batch tile; columns are samples (batch on the lane axis)."""
    b3 = b3_ref[0]  # scalar fc3 bias from SMEM

    def body(j, carry):
        c0 = pl.multiple_of(j * sub, 128)
        xs = xT_ref[:, pl.ds(c0, sub)]                               # (in, sub)
        # Layer 1: Linear(input_size, 64) + ReLU          (MXU, K = in_dim)
        h1 = jnp.dot(w1_ref[...], xs, preferred_element_type=jnp.float32)
        h1 = jnp.maximum(h1 + b1_ref[...], 0.0)                      # (64, sub)
        # Layer 2: Linear(64, 32) + ReLU                  (MXU, K = 64)
        h2 = jnp.dot(w2_ref[...], h1, preferred_element_type=jnp.float32)
        h2 = jnp.maximum(h2 + b2_ref[...], 0.0)                      # (32, sub)
        # Layer 3: Linear(32, 1) as VPU multiply + sublane (XLU) reduction;
        # result is a lane-dense (1, sub) row -> unmasked vst.
        out = jnp.sum(w3_ref[...] * h2, axis=0, keepdims=True) + b3
        o_ref[:, pl.ds(c0, sub)] = out.astype(o_ref.dtype)
        return carry

    # Short, fixed trip count: fully unroll for LLO scheduler visibility while
    # keeping per-sub-block live ranges bounded.
    lax.fori_loop(0, n_sub, body, 0, unroll=True)


@functools.partial(jax.jit, static_argnames=("tile_b",))
def regression_model_forward(x, params, *, tile_b=TILE_B):
    """3-layer MLP forward pass as a single batch-tiled Pallas kernel."""
    w1, b1, w2, b2, w3, b3 = params
    batch, in_dim = x.shape

    padded, tile_b, sub = _choose_tiling(batch, tile_b)
    n_sub = tile_b // sub
    grid = (padded // tile_b,)

    # Batch onto the lane axis. Under jit the transpose+pad fuses into one
    # copy (no separate host-side pad pass over x).
    xT = jnp.pad(x.T, ((0, 0), (0, padded - batch)))

    # Weights/biases: full-array blocks, constant index_map -> DMA'd once,
    # VMEM-resident across all grid steps.
    resident = lambda a: pl.BlockSpec(a.shape, lambda i: (0,) * a.ndim)

    out_row = pl.pallas_call(
        functools.partial(mlp_kernel, sub=sub, n_sub=n_sub),
        out_shape=jax.ShapeDtypeStruct((1, padded), jnp.float32),
        grid=grid,
        in_specs=[
            pl.BlockSpec((in_dim, tile_b), lambda i: (0, i)),   # x^T tiled on lanes
            resident(w1), resident(b1),
            resident(w2), resident(b2),
            resident(w3),
            pl.BlockSpec(memory_space=pltpu.MemorySpace.SMEM),  # fc3 scalar bias
        ],
        out_specs=pl.BlockSpec((1, tile_b), lambda i: (0, i)),  # lane-dense output
        # TODO(synk): on v7x, sweep pltpu.CORE_PARALLEL / pl.core_map to shard the
        # batch axis over both TensorCores; "parallel" is a safe no-op on 1-TC chips.
        compiler_params=pltpu.CompilerParams(
            dimension_semantics=("parallel",)),
    )(xT, w1, b1, w2, b2, w3, b3)

    return out_row[0, :batch].reshape(batch, 1)


def init_params(key, input_size):
    """PyTorch nn.Linear-style init (uniform +/- 1/sqrt(fan_in)).

    Layouts match the transposed (batch-on-lane) kernel dataflow:
      fc1.weight (64, in),  fc1.bias (64, 1)     [torch (out, in); bias as column]
      fc2.weight (32, 64),  fc2.bias (32, 1)
      fc3.weight stored transposed as (32, 1), fc3.bias (1,) scalar (SMEM)
    """
    dims = [(input_size, 64), (64, 32), (32, 1)]
    params = []
    for li, (fan_in, fan_out) in enumerate(dims):
        key, kw, kb = jax.random.split(key, 3)
        bound = 1.0 / math.sqrt(fan_in)
        w = jax.random.uniform(kw, (fan_out, fan_in), jnp.float32, -bound, bound)
        b = jax.random.uniform(kb, (fan_out, 1), jnp.float32, -bound, bound)
        if li == 2:
            w = w.reshape(fan_in, 1)   # (32, 1) column for the VPU reduction
            b = b.reshape(1)           # scalar bias -> SMEM
        params.extend([w, b])
    return tuple(params)


def reference_forward(x, params):
    """Pure-JAX reference for correctness checking."""
    w1, b1, w2, b2, w3_col, b3 = params
    h1 = jnp.maximum(x @ w1.T + b1.T, 0.0)
    h2 = jnp.maximum(h1 @ w2.T + b2.T, 0.0)
    return h2 @ w3_col + b3


if __name__ == "__main__":
    key = jax.random.PRNGKey(0)
    input_size = 8  # California-housing-style feature count

    key, kp = jax.random.split(key)
    params = init_params(kp, input_size)

    # Case 1: small batch -> single grid step, single sub-block.
    key, kx1 = jax.random.split(key)
    x1 = jax.random.normal(kx1, (64, input_size), dtype=jnp.float32)
    y1 = regression_model_forward(x1, params)
    jax.block_until_ready(y1)
    assert y1.shape == (64, 1), y1.shape
    assert jnp.allclose(y1, reference_forward(x1, params), atol=1e-5, rtol=1e-5)

    # Case 2: tiny ragged batch -> pad/slice path.
    key, kx2 = jax.random.split(key)
    x2 = jax.random.normal(kx2, (13, input_size), dtype=jnp.float32)
    y2 = regression_model_forward(x2, params, tile_b=256)
    jax.block_until_ready(y2)
    assert y2.shape == (13, 1), y2.shape
    assert jnp.allclose(y2, reference_forward(x2, params), atol=1e-5, rtol=1e-5)

    # Case 3: ragged multi-step grid + inner sub-block loop (tile_b=1024, sub=512).
    key, kx3 = jax.random.split(key)
    x3 = jax.random.normal(kx3, (1300, input_size), dtype=jnp.float32)
    y3 = regression_model_forward(x3, params, tile_b=1024)
    jax.block_until_ready(y3)
    assert y3.shape == (1300, 1), y3.shape
    assert jnp.allclose(y3, reference_forward(x3, params), atol=1e-5, rtol=1e-5)

    print("KERNEL_OK")
</pallas_src>

<mosaic_0001>
module attributes {stable_mosaic.version = 11 : i64} {
  func.func @mlp_kernel(%arg0: i32, %arg1: memref<8x128xf32, #tpu.memory_space<vmem>>, %arg2: memref<64x8xf32, #tpu.memory_space<vmem>>, %arg3: memref<64x1xf32, #tpu.memory_space<vmem>>, %arg4: memref<32x64xf32, #tpu.memory_space<vmem>>, %arg5: memref<32x1xf32, #tpu.memory_space<vmem>>, %arg6: memref<32x1xf32, #tpu.memory_space<vmem>>, %arg7: memref<1xf32, #tpu.memory_space<smem>>, %arg8: memref<1x128xf32, #tpu.memory_space<vmem>>) attributes {dimension_semantics = [#tpu.dimension_semantics<parallel>], iteration_bounds = array<i64: 1>, scalar_prefetch = 0 : i64, scratch_operands = 0 : i64, tpu.core_type = #tpu.core_type<tc>, window_params = [{transform_indices = @transform_0, window_bounds = array<i64: 8, 128>}, {pipeline_mode = #tpu.pipeline_mode<synchronous>, transform_indices = @transform_1, window_bounds = array<i64: 64, 8>}, {pipeline_mode = #tpu.pipeline_mode<synchronous>, transform_indices = @transform_2, window_bounds = array<i64: 64, 1>}, {pipeline_mode = #tpu.pipeline_mode<synchronous>, transform_indices = @transform_3, window_bounds = array<i64: 32, 64>}, {pipeline_mode = #tpu.pipeline_mode<synchronous>, transform_indices = @transform_4, window_bounds = array<i64: 32, 1>}, {pipeline_mode = #tpu.pipeline_mode<synchronous>, transform_indices = @transform_5, window_bounds = array<i64: 32, 1>}, {transform_indices = @transform_6, window_bounds = array<i64: 1>}, {transform_indices = @transform_7, window_bounds = array<i64: 1, 128>}]} {
    %c0 = arith.constant 0 : index
    %0 = memref.load %arg7[%c0] : memref<1xf32, #tpu.memory_space<smem>>
    %c0_i32 = arith.constant 0 : i32
    %c128_i32 = arith.constant 128 : i32
    %1 = arith.muli %c0_i32, %c128_i32 : i32
    %2 = tpu.assume_multiple %1, 128 : i32
    %c0_0 = arith.constant 0 : index
    %3 = arith.index_cast %2 : i32 to index
    %4 = vector.load %arg1[%c0_0, %3] : memref<8x128xf32, #tpu.memory_space<vmem>>, vector<8x128xf32>
    %c0_1 = arith.constant 0 : index
    %c0_2 = arith.constant 0 : index
    %5 = vector.load %arg2[%c0_1, %c0_2] : memref<64x8xf32, #tpu.memory_space<vmem>>, vector<64x8xf32>
    %cst = arith.constant dense<0.000000e+00> : vector<64x128xf32>
    %6 = tpu.matmul %5, %4, %cst {dimension_numbers = #tpu.dot_dimension_numbers<[1], [0], [0], [1], [0, 0, 1, 1], [], []>} : vector<64x8xf32>, vector<8x128xf32>, vector<64x128xf32> -> vector<64x128xf32>
    %c0_3 = arith.constant 0 : index
    %c0_4 = arith.constant 0 : index
    %7 = vector.load %arg3[%c0_3, %c0_4] : memref<64x1xf32, #tpu.memory_space<vmem>>, vector<64x1xf32>
    %8 = vector.broadcast %7 : vector<64x1xf32> to vector<64x128xf32>
    %9 = arith.addf %6, %8 : vector<64x128xf32>
    %cst_5 = arith.constant 0.000000e+00 : f32
    %10 = vector.broadcast %cst_5 : f32 to vector<64x128xf32>
    %11 = arith.maximumf %9, %10 : vector<64x128xf32>
    %c0_6 = arith.constant 0 : index
    %c0_7 = arith.constant 0 : index
    %12 = vector.load %arg4[%c0_6, %c0_7] : memref<32x64xf32, #tpu.memory_space<vmem>>, vector<32x64xf32>
    %cst_8 = arith.constant dense<0.000000e+00> : vector<32x128xf32>
    %13 = tpu.matmul %12, %11, %cst_8 {dimension_numbers = #tpu.dot_dimension_numbers<[1], [0], [0], [1], [0, 0, 1, 1], [], []>} : vector<32x64xf32>, vector<64x128xf32>, vector<32x128xf32> -> vector<32x128xf32>
    %c0_9 = arith.constant 0 : index
    %c0_10 = arith.constant 0 : index
    %14 = vector.load %arg5[%c0_9, %c0_10] : memref<32x1xf32, #tpu.memory_space<vmem>>, vector<32x1xf32>
    %15 = vector.broadcast %14 : vector<32x1xf32> to vector<32x128xf32>
    %16 = arith.addf %13, %15 : vector<32x128xf32>
    %cst_11 = arith.constant 0.000000e+00 : f32
    %17 = vector.broadcast %cst_11 : f32 to vector<32x128xf32>
    %18 = arith.maximumf %16, %17 : vector<32x128xf32>
    %c0_12 = arith.constant 0 : index
    %c0_13 = arith.constant 0 : index
    %19 = vector.load %arg6[%c0_12, %c0_13] : memref<32x1xf32, #tpu.memory_space<vmem>>, vector<32x1xf32>
    %20 = vector.broadcast %19 : vector<32x1xf32> to vector<32x128xf32>
    %21 = arith.mulf %20, %18 : vector<32x128xf32>
    %cst_14 = arith.constant dense<0.000000e+00> : vector<128xf32>
    %22 = vector.multi_reduction <add>, %21, %cst_14 [0] : vector<32x128xf32> to vector<128xf32>
    %23 = vector.shape_cast %22 : vector<128xf32> to vector<1x128xf32>
    %24 = vector.broadcast %0 : f32 to vector<1x128xf32>
    %25 = arith.addf %23, %24 : vector<1x128xf32>
    %c0_15 = arith.constant 0 : index
    %26 = arith.index_cast %2 : i32 to index
    %27 = vector.load %arg8[%c0_15, %26] : memref<1x128xf32, #tpu.memory_space<vmem>>, vector<1x128xf32>
    tpu.vector_store %arg8[%c0_15, %26], %25 {strides = array<i32>} : memref<1x128xf32, #tpu.memory_space<vmem>>, vector<1x128xf32>,
    %c1_i32 = arith.constant 1 : i32
    return
  }
  func.func @transform_0(%arg0: i32) -> (i32, i32) {
    %c0_i32 = arith.constant 0 : i32
    %c0_i32_0 = arith.constant 0 : i32
    return %c0_i32, %arg0 : i32, i32
  }
  func.func @transform_1(%arg0: i32) -> (i32, i32) {
    %c0_i32 = arith.constant 0 : i32
    %c0_i32_0 = arith.constant 0 : i32
    %c0_i32_1 = arith.constant 0 : i32
    return %c0_i32, %c0_i32_0 : i32, i32
  }
  func.func @transform_2(%arg0: i32) -> (i32, i32) {
    %c0_i32 = arith.constant 0 : i32
    %c0_i32_0 = arith.constant 0 : i32
    %c0_i32_1 = arith.constant 0 : i32
    return %c0_i32, %c0_i32_0 : i32, i32
  }
  func.func @transform_3(%arg0: i32) -> (i32, i32) {
    %c0_i32 = arith.constant 0 : i32
    %c0_i32_0 = arith.constant 0 : i32
    %c0_i32_1 = arith.constant 0 : i32
    return %c0_i32, %c0_i32_0 : i32, i32
  }
  func.func @transform_4(%arg0: i32) -> (i32, i32) {
    %c0_i32 = arith.constant 0 : i32
    %c0_i32_0 = arith.constant 0 : i32
    %c0_i32_1 = arith.constant 0 : i32
    return %c0_i32, %c0_i32_0 : i32, i32
  }
  func.func @transform_5(%arg0: i32) -> (i32, i32) {
    %c0_i32 = arith.constant 0 : i32
    %c0_i32_0 = arith.constant 0 : i32
    %c0_i32_1 = arith.constant 0 : i32
    return %c0_i32, %c0_i32_0 : i32, i32
  }
  func.func @transform_6(%arg0: i32) -> i32 {
    %c0_i32 = arith.constant 0 : i32
    %c0_i32_0 = arith.constant 0 : i32
    return %c0_i32 : i32
  }
  func.func @transform_7(%arg0: i32) -> (i32, i32) {
    %c0_i32 = arith.constant 0 : i32
    %c0_i32_0 = arith.constant 0 : i32
    return %c0_i32, %arg0 : i32, i32
  }
}

</mosaic_0001>

<bundles_post_ra>
// kernel: regression_model_forward.1
= control target key start
LH: loop header
LB: loop body
LE: loop exit
PB: predicated region body
PF: predicated region fallthrough
CT: control target
= control target key end

     0   :  { %vm85_vm0 = vcmask 64512   ;;  %v493_v3 = vmov 0   ;;  %vm251_vm1 = vcmask 523264   ;;  %s639_s0 = inlined_call_operand.vmem [shape: f32[8,128], index: 0, kind: input, shape index: {}]   ;;  %s640_s1 = inlined_call_operand.vmem [shape: f32[64,8], index: 1, kind: input, shape index: {}]   ;;  %s641_s2 = inlined_call_operand.vmem [shape: f32[64,1], index: 2, kind: input, shape index: {}]   ;;  %s642_s4 = inlined_call_operand.vmem [shape: f32[32,1], index: 4, kind: input, shape index: {}]   ;;  %s643_s5 = inlined_call_operand.vmem [shape: f32[32,1], index: 5, kind: input, shape index: {}]   ;;  %s644_s3 = inlined_call_operand.vmem [shape: f32[32,64], index: 3, kind: input, shape index: {}]   ;;  %s645_s6 = inlined_call_operand.<no memory space> [shape: f32[1], index: 6, kind: input, shape index: {}]   ;;  %s646_s7 = inlined_call_operand.vmem [shape: f32[1,128], index: 7, kind: output, shape index: {}]  }
   0x1   :  { %v28_v0 = vld [vmem:[%s639_s0] sm:$0xff]  ;;  %v30_v2 = vld [vmem:[%s640_s1 + $0x8] sm:$0xff]  ;;  %491 = vset.pattern.permute.xlu0 %v493_v3  ;;  %492 = vset.pattern.permute.xlu1 %v493_v3  ;;  %v31_v4 = vld [vmem:[%s640_s1 + $0x10] sm:$0xff] }
   0x2   :  { %v29_v1 = vld [vmem:[%s640_s1] sm:$0xff]  ;;  %430 = vmatprep.subr.mxu0 %v28_v0  ;;  %v39_v6 = vld [vmem:[%s641_s2 + $0x10] sm:$0xff]  ;;  %v32_v7 = vld [vmem:[%s640_s1 + $0x18] sm:$0xff] }
   0x3   :  { %432 = vmatprep.mubr.msk.f32.mxu0 %vm85_vm0, %v29_v1  ;;  %431 = vmatpush3.msra.mxu0 %v28_v0  ;;  %v37_v5 = vld [vmem:[%s641_s2] sm:$0xff]  ;;  %v38_v9 = vld [vmem:[%s641_s2 + $0x8] sm:$0xff]  ;;  %v40_v10 = vld [vmem:[%s641_s2 + $0x18] sm:$0xff] }
   0x4   :  { %433 = vmatmul.mubr.msk.f32.vlgmr.msra.gmra.mrb[0].mxu0 %vm85_vm0, %v30_v2  ;;  %47 = vperm.xlu0 %491, %v37_v5   ;;  %v33_v8 = vld [vmem:[%s640_s1 + $0x20] sm:$0xff]  ;;  %v34_v11 = vld [vmem:[%s640_s1 + $0x28] sm:$0xff]  ;;  %v35_v12 = vld [vmem:[%s640_s1 + $0x30] sm:$0xff] }
   0x5   :  { %435 = vmatprep.mubr.msk.f32.mxu0 %vm85_vm0, %v31_v4  ;;  %57 = vperm.xlu1 %492, %v39_v6   ;;  %v41_v13 = vld [vmem:[%s641_s2 + $0x20] sm:$0xff]  ;;  %v42_v14 = vld [vmem:[%s641_s2 + $0x28] sm:$0xff]  ;;  %v36_v15 = vld [vmem:[%s640_s1 + $0x38] sm:$0xff] }
   0x6   :  { %v43_v16 = vld [vmem:[%s641_s2 + $0x30] sm:$0xff]  ;;  %v44_v17 = vld [vmem:[%s641_s2 + $0x38] sm:$0xff]  ;;  %v227_v18 = vld [vmem:[%s642_s4] sm:$0xff] }
   0x7   :  { %v228_v19 = vld [vmem:[%s642_s4 + $0x8] sm:$0xff]  ;;  %v229_v20 = vld [vmem:[%s642_s4 + $0x10] sm:$0xff]  ;;  %v230_v21 = vld [vmem:[%s642_s4 + $0x18] sm:$0xff] }
   0x8   :  { %436 = vmatmul.mubr.msk.f32.gmra.mrb[2].mxu0 %vm85_vm0, %v32_v7  ;;  %52 = vperm.xlu0 %491, %v38_v9   ;;  %v353_v22 = vld [vmem:[%s643_s5] sm:$0xff]  ;;  %v354_v23 = vld [vmem:[%s643_s5 + $0x8] sm:$0xff]  ;;  %v355_v24 = vld [vmem:[%s643_s5 + $0x10] sm:$0xff] }
   0x9   :  { %438 = vmatprep.mubr.msk.f32.mxu0 %vm85_vm0, %v33_v8  ;;  %62 = vperm.xlu1 %492, %v40_v10   ;;  %v356_v25 = vld [vmem:[%s643_s5 + $0x18] sm:$0xff]  ;;  %v223_v26 = vld [vmem:[%s644_s3] sm:$0xff]  ;;  %v225_v27 = vld [vmem:[%s644_s3 + $0x10] sm:$0xff] }
   0xa   :  { %463 = vmatprep.mubr.msk.f32.mxu1 %vm251_vm1, %v225_v27  ;;  %v224_v0 = vld [vmem:[%s644_s3 + $0x8] sm:$0xff]  ;;  %v226_v1 = vld [vmem:[%s644_s3 + $0x18] sm:$0xff] }
   0xc   :  { %439 = vmatmul.mubr.msk.f32.gmra.mrb[4].mxu0 %vm85_vm0, %v34_v11  ;;  %67 = vperm.xlu0 %491, %v41_v13  }
   0xd   :  { %441 = vmatprep.mubr.msk.f32.mxu0 %vm85_vm0, %v35_v12  ;;  %72 = vperm.xlu1 %492, %v42_v14  }
  0x10   :  { %442 = vmatmul.mubr.msk.f32.gmra.mrb[6].mxu0 %vm85_vm0, %v36_v15  ;;  %77 = vperm.xlu0 %491, %v43_v16  }
  0x11   :  { %82 = vperm.xlu1 %492, %v44_v17   ;;  %460 = vmatprep.mubr.msk.f32.mxu0 %vm251_vm1, %v223_v26 }
  0x14   :  { %233 = vperm.xlu0 %491, %v227_v18  }
  0x15   :  { %238 = vperm.xlu1 %492, %v228_v19  }
  0x18   :  { %243 = vperm.xlu0 %491, %v229_v20  }
  0x19   :  { %248 = vperm.xlu1 %492, %v230_v21  }
  0x1c   :  { %359 = vperm.xlu0 %491, %v353_v22  }
  0x1d   :  { %364 = vperm.xlu1 %492, %v354_v23  }
  0x20   :  { %369 = vperm.xlu0 %491, %v355_v24  }
  0x21   :  { %374 = vperm.xlu1 %492, %v356_v25  }
  0x83   :  { %v48_v28 = vpop.permute.xlu0 %47 }
  0x84   :  { %v58_v29 = vpop.permute.xlu1 %57 }
  0x87   :  { %v53_v30 = vpop.permute.xlu0 %52 }
  0x88   :  { %v63_v31 = vpop.permute.xlu1 %62 }
  0x8b   :  { %v68_v44 = vpop.permute.xlu0 %67 }
  0x8c   :  { %v73_v41 = vpop.permute.xlu1 %72 }
  0x8f   :  { %v78_v56 = vpop.permute.xlu0 %77 }
  0x90   :  { %v83_v53 = vpop.permute.xlu1 %82 }
  0x93   :  { %v234_v2 = vpop.permute.xlu0 %233 }
  0x94   :  { %v239_v3 = vpop.permute.xlu1 %238 }
  0x97   :  { %v244_v4 = vpop.permute.xlu0 %243 }
  0x98   :  { %v249_v5 = vpop.permute.xlu1 %248 }
  0x9b   :  { %v360_v6 = vpop.permute.xlu0 %359 }
  0x9c   :  { %v365_v15 = vpop.permute.xlu1 %364 }
  0x9f   :  { %v370_v22 = vpop.permute.xlu0 %369 }
  0xa0   :  { %v375_v25 = vpop.permute.xlu1 %374 }
  0xd7   :  { %v434_v32 = vpop.f32.mrb[0].mxu0 }
  0xd8   :  { %v182_v33 = vadd.f32 %v434_v32, %v53_v30  ;;  %v176_v34 = vpop.f32.mrb[1].mxu0 }
  0xd9   :  { %v177_v35 = vadd.f32 %v176_v34, %v48_v28  ;;  %v390_v34 = vstv %s645_s6 }
  0xda   :  { %v216_v36 = vmax.f32 %v182_v33, 0.0 }
  0xdb   :  { %v215_v37 = vmax.f32 %v177_v35, 0.0  ;;  %v437_v38 = vpop.f32.mrb[2].mxu0 }
  0xdc   :  { %v192_v39 = vadd.f32 %v437_v38, %v63_v31  ;;  %v186_v40 = vpop.f32.mrb[3].mxu0 }
  0xdd   :  { %v466_v42 = vpack.c.bf16 %v216_v36, %v215_v37  ;;  %v187_v43 = vadd.f32 %v186_v40, %v58_v29 }
  0xde   :  { %v218_v45 = vmax.f32 %v192_v39, 0.0 }
  0xdf   :  { %v217_v46 = vmax.f32 %v187_v43, 0.0  ;;  %v440_v47 = vpop.f32.mrb[4].mxu0  ;;  %467 = vmatprep.subr.bf16.mxu0 %v466_v42  ;;  %482 = vmatprep.subr.bf16.mxu1 %v466_v42 }
  0xe0   :  { %v202_v48 = vadd.f32 %v440_v47, %v73_v41  ;;  %v196_v49 = vpop.f32.mrb[5].mxu0  ;;  %469 = vmatpush3.bf16.msra.mxu0 %v466_v42  ;;  %486 = vmatpush3.bf16.msra.mxu1 %v466_v42 }
  0xe1   :  { %v470_v50 = vpack.c.bf16 %v218_v45, %v217_v46  ;;  %v197_v51 = vadd.f32 %v196_v49, %v68_v44 }
  0xe2   :  { %v220_v52 = vmax.f32 %v202_v48, 0.0 }
  0xe3   :  { %v219_v54 = vmax.f32 %v197_v51, 0.0  ;;  %v443_v55 = vpop.f32.mrb[6].mxu0  ;;  %471 = vmatprep.subr.bf16.mxu0 %v470_v50  ;;  %483 = vmatprep.subr.bf16.mxu1 %v470_v50 }
  0xe4   :  { %v212_v57 = vadd.f32 %v443_v55, %v83_v53  ;;  %v206_v58 = vpop.f32.mrb[7].mxu0  ;;  %473 = vmatpush3.bf16.msra.mxu0 %v470_v50  ;;  %487 = vmatpush3.bf16.msra.mxu1 %v470_v50 }
  0xe5   :  { %v474_v59 = vpack.c.bf16 %v220_v52, %v219_v54  ;;  %v207_v60 = vadd.f32 %v206_v58, %v78_v56 }
  0xe6   :  { %v222_v61 = vmax.f32 %v212_v57, 0.0 }
  0xe7   :  { %v221_v62 = vmax.f32 %v207_v60, 0.0  ;;  %475 = vmatprep.subr.bf16.mxu0 %v474_v59  ;;  %484 = vmatprep.subr.bf16.mxu1 %v474_v59 }
  0xe8   :  { %477 = vmatpush3.bf16.msra.mxu0 %v474_v59  ;;  %488 = vmatpush3.bf16.msra.mxu1 %v474_v59 }
  0xe9   :  { %v478_v63 = vpack.c.bf16 %v222_v61, %v221_v62 }
  0xeb   :  { %479 = vmatprep.subr.bf16.mxu0 %v478_v63  ;;  %485 = vmatprep.subr.bf16.mxu1 %v478_v63 }
  0xec   :  { %481 = vmatpush3.bf16.msra.mxu0 %v478_v63  ;;  %489 = vmatpush3.bf16.msra.mxu1 %v478_v63 }
  0xef   :  { %461 = vmatmul.mubr.msk.f32.vlgmr.msra.gmra.mrb[8].mxu0 %vm251_vm1, %v224_v0  ;;  %464 = vmatmul.mubr.msk.f32.vlgmr.msra.gmra.mrb[0].mxu1 %vm251_vm1, %v226_v1 }
 0x1c2   :  { %v462_v7 = vpop.f32.mrb[8].mxu0  ;;  %v465_v8 = vpop.f32.mrb[0].mxu1 }
 0x1c3   :  { %v336_v9 = vadd.f32 %v462_v7, %v239_v3  ;;  %v330_v10 = vpop.f32.mrb[9].mxu0  ;;  %v340_v11 = vpop.f32.mrb[1].mxu1  ;;  %v346_v12 = vadd.f32 %v465_v8, %v249_v5 }
 0x1c4   :  { %v331_v13 = vadd.f32 %v330_v10, %v234_v2  ;;  %v341_v14 = vadd.f32 %v340_v11, %v244_v4 }
 0x1c5   :  { %v350_v16 = vmax.f32 %v336_v9, 0.0  ;;  %v352_v20 = vmax.f32 %v346_v12, 0.0 }
 0x1c6   :  { %v349_v17 = vmax.f32 %v331_v13, 0.0  ;;  %v351_v18 = vmax.f32 %v341_v14, 0.0 }
 0x1c7   :  { %v378_v19 = vmul.f32 %v365_v15, %v350_v16  ;;  %v380_v26 = vmul.f32 %v375_v25, %v352_v20 }
 0x1c8   :  { %v377_v21 = vmul.f32 %v360_v6, %v349_v17  ;;  %v379_v24 = vmul.f32 %v370_v22, %v351_v18 }
 0x1ca   :  { %v381_v23 = vadd.f32 %v378_v19, %v377_v21 }
 0x1cc   :  { %v382_v27 = vadd.f32 %v381_v23, %v379_v24 }
 0x1ce   :  { %v383_v28 = vadd.f32 %v382_v27, %v380_v26 }
 0x1d0   :  { %v384_v29 = vrot.slane %v383_v28, 4 }
 0x1d2   :  { %v385_v30 = vadd.f32 %v384_v29, %v383_v28 }
 0x1d4   :  { %v386_v31 = vrot.slane %v385_v30, 2 }
 0x1d6   :  { %v387_v32 = vadd.f32 %v386_v31, %v385_v30 }
 0x1d8   :  { %v388_v33 = vrot.slane %v387_v32, 1 }
 0x1da   :  { %v389_v35 = vadd.f32 %v388_v33, %v387_v32 }
 0x1dc   :  { %v391_v36 = vadd.f32 %v390_v34, %v389_v35 }
 0x1de   :  { %392 = vst [vmem:[%s646_s7] sm:$0x1] %v391_v36 }

</bundles_post_ra>
